<compile_context>
chip_gen: v7x
topology: tpu7x:2x2x1
jax: 0.10.0
libtpu: 0.0.40
codegen_flags: <defaults>
</compile_context>

<pallas_src>
import functools

import jax
import jax.numpy as jnp
from jax.experimental import pallas as pl
from jax.experimental.pallas import tpu as pltpu

_LANES = 128
_SUBLANES = 8
_NUM_PARALLEL_BLOCKS = 2            # v7x has 2 TCs; harmless on v5e/v6e (1 TC)
_TARGET_TILE_BYTES = 1 << 20        # ~1 MiB per-input tile: near HBM roofline


def _cdiv(a, b):
    return -(-a // b)


def _round_up(a, b):
    return _cdiv(a, b) * b


def _custom_loss_kernel(cbf_pred_ref, att_pred_ref, cbf_true_ref, att_true_ref,
                        cbf_lv_ref, att_lv_ref, out_ref, *, att_weight):
    """Per-tile loss; accumulates a lane-dense (8,128) partial sum per
    parallel block (output block stays resident across the reduction axis)."""
    t = pl.program_id(1)

    cbf_pred = cbf_pred_ref[...].astype(jnp.float32)
    att_pred = att_pred_ref[...].astype(jnp.float32)
    cbf_true = cbf_true_ref[...].astype(jnp.float32)
    att_true = att_true_ref[...].astype(jnp.float32)
    cbf_lv = cbf_lv_ref[...].astype(jnp.float32)
    att_lv = att_lv_ref[...].astype(jnp.float32)

    # cbf_loss = 0.5 * (exp(-cbf_log_var) * (cbf_pred - cbf_true)^2 + cbf_log_var)
    cbf_loss = 0.5 * (jnp.exp(-cbf_lv) * (cbf_pred - cbf_true) ** 2 + cbf_lv)
    # att_loss = 0.5 * (exp(-att_log_var) * (att_pred - att_true)^2 + att_log_var)
    att_loss = 0.5 * (jnp.exp(-att_lv) * (att_pred - att_true) ** 2 + att_lv)
    # att_weights = exp(-att_true / 2000)
    att_w = jnp.exp(att_true * (-1.0 / 2000.0))

    total = cbf_loss + att_loss * att_w * att_weight

    # Fold the (TR, 128) tile into one vreg-shaped (8, 128) slab with pure
    # vreg-wise VALU adds (layout-preserving reshape; no cross-lane reduce).
    tr = total.shape[0]
    partial = total.reshape(tr // _SUBLANES, _SUBLANES, _LANES).sum(axis=0)

    @pl.when(t == 0)
    def _():
        out_ref[...] = jnp.zeros_like(out_ref)

    out_ref[...] += partial


def custom_loss(cbf_pred, att_pred, cbf_true, att_true,
                cbf_log_var, att_log_var, epoch,
                att_weight_schedule=None,
                target_tile_bytes=_TARGET_TILE_BYTES):
    """Pallas implementation of CustomLoss.forward. Returns a scalar f32."""
    schedule = att_weight_schedule or (lambda _: 1.0)
    att_weight = float(schedule(epoch))

    args = [jnp.asarray(a) for a in (cbf_pred, att_pred, cbf_true, att_true,
                                     cbf_log_var, att_log_var)]
    # Keep native floating dtypes (bf16 halves HBM traffic); promote others.
    args = [a if jnp.issubdtype(a.dtype, jnp.floating) else a.astype(jnp.float32)
            for a in args]

    n_total = int(args[0].size)
    max_itemsize = max(a.dtype.itemsize for a in args)

    # Rows of a lane-dense (rows, 128) slab holding all elements.
    rows = _cdiv(n_total, _LANES)

    # Row tile: largest multiple of 8 near the byte target, but no bigger than
    # one parallel block's (rounded-up) share of the rows.
    tr_target = max(_SUBLANES,
                    (target_tile_bytes // (_LANES * max_itemsize))
                    // _SUBLANES * _SUBLANES)
    rows_per_block = _round_up(_cdiv(rows, _NUM_PARALLEL_BLOCKS), _SUBLANES)
    tr = min(tr_target, rows_per_block)

    num_t = _cdiv(rows, _NUM_PARALLEL_BLOCKS * tr)
    rows_padded = _NUM_PARALLEL_BLOCKS * num_t * tr
    n_padded = rows_padded * _LANES

    def to_slab(a):
        flat = a.reshape(-1)
        if n_padded != n_total:
            # Zero padding contributes exactly 0 to the loss sum.
            flat = jnp.pad(flat, (0, n_padded - n_total))
        return flat.reshape(rows_padded, _LANES)

    slabs = [to_slab(a) for a in args]

    in_spec = pl.BlockSpec((tr, _LANES), lambda p, t: (p * num_t + t, 0))
    out_spec = pl.BlockSpec((_SUBLANES, _LANES), lambda p, t: (p, 0))

    kernel = functools.partial(_custom_loss_kernel, att_weight=att_weight)

    partial_sums = pl.pallas_call(
        kernel,
        out_shape=jax.ShapeDtypeStruct(
            (_NUM_PARALLEL_BLOCKS * _SUBLANES, _LANES), jnp.float32),
        grid=(_NUM_PARALLEL_BLOCKS, num_t),
        in_specs=[in_spec] * 6,
        out_specs=out_spec,
        compiler_params=pltpu.CompilerParams(
            dimension_semantics=("parallel", "arbitrary")),
    )(*slabs)

    # Tiny final cross-lane reduce + mean in plain JAX.
    return (jnp.sum(partial_sums) / jnp.float32(n_total)).astype(jnp.float32)


def _reference_loss(cbf_pred, att_pred, cbf_true, att_true,
                    cbf_log_var, att_log_var, att_weight):
    f = lambda x: jnp.asarray(x, jnp.float32)
    cbf_pred, att_pred, cbf_true, att_true, cbf_log_var, att_log_var = map(
        f, (cbf_pred, att_pred, cbf_true, att_true, cbf_log_var, att_log_var))
    cbf_loss = 0.5 * (jnp.exp(-cbf_log_var) * (cbf_pred - cbf_true) ** 2
                      + cbf_log_var)
    att_loss = 0.5 * (jnp.exp(-att_log_var) * (att_pred - att_true) ** 2
                      + att_log_var)
    att_w = jnp.exp(-att_true / 2000.0)
    return jnp.mean(cbf_loss + att_loss * att_w * att_weight)


def _make_inputs(key, shape):
    ks = jax.random.split(key, 6)
    cbf_pred = jax.random.normal(ks[0], shape, jnp.float32) * 10.0 + 60.0
    att_pred = jax.random.normal(ks[1], shape, jnp.float32) * 100.0 + 1500.0
    cbf_true = jax.random.normal(ks[2], shape, jnp.float32) * 10.0 + 60.0
    att_true = jax.random.normal(ks[3], shape, jnp.float32) * 100.0 + 1500.0
    cbf_log_var = jax.random.normal(ks[4], shape, jnp.float32) * 0.1
    att_log_var = jax.random.normal(ks[5], shape, jnp.float32) * 0.1
    return cbf_pred, att_pred, cbf_true, att_true, cbf_log_var, att_log_var


if __name__ == "__main__":
    key = jax.random.PRNGKey(0)
    epoch = 3
    schedule = lambda e: min(1.0, 0.25 * (e + 1))  # example schedule
    att_w = float(schedule(epoch))

    # Test 1: module-consistent small shape (batch=16, 128 values each).
    k1, k2, k3 = jax.random.split(key, 3)
    ins = _make_inputs(k1, (16, 128))
    loss = jax.block_until_ready(
        custom_loss(*ins, epoch, att_weight_schedule=schedule))
    ref = jax.block_until_ready(_reference_loss(*ins, att_w))
    assert jnp.allclose(loss, ref, rtol=1e-4, atol=1e-4), (loss, ref)

    # Test 2: ragged shape (exercises zero-padding of the lane-dense slab).
    ins = _make_inputs(k2, (7, 33))
    loss = jax.block_until_ready(
        custom_loss(*ins, epoch, att_weight_schedule=schedule))
    ref = jax.block_until_ready(_reference_loss(*ins, att_w))
    assert jnp.allclose(loss, ref, rtol=1e-4, atol=1e-4), (loss, ref)

    # Test 3: force a small tile to exercise multi-step accumulation (num_t>1).
    ins = _make_inputs(k3, (64, 128))
    loss = jax.block_until_ready(
        custom_loss(*ins, epoch, att_weight_schedule=schedule,
                    target_tile_bytes=4096))
    ref = jax.block_until_ready(_reference_loss(*ins, att_w))
    assert jnp.allclose(loss, ref, rtol=1e-4, atol=1e-4), (loss, ref)

    print("KERNEL_OK")
</pallas_src>

<mosaic_0001>
module attributes {stable_mosaic.version = 11 : i64} {
  func.func @_custom_loss_kernel(%arg0: i32, %arg1: i32, %arg2: memref<8x128xf32, #tpu.memory_space<vmem>>, %arg3: memref<8x128xf32, #tpu.memory_space<vmem>>, %arg4: memref<8x128xf32, #tpu.memory_space<vmem>>, %arg5: memref<8x128xf32, #tpu.memory_space<vmem>>, %arg6: memref<8x128xf32, #tpu.memory_space<vmem>>, %arg7: memref<8x128xf32, #tpu.memory_space<vmem>>, %arg8: memref<8x128xf32, #tpu.memory_space<vmem>>) attributes {dimension_semantics = [#tpu.dimension_semantics<parallel>, #tpu.dimension_semantics<arbitrary>], iteration_bounds = array<i64: 2, 1>, scalar_prefetch = 0 : i64, scratch_operands = 0 : i64, tpu.core_type = #tpu.core_type<tc>, window_params = [{transform_indices = @transform_0, window_bounds = array<i64: 8, 128>}, {transform_indices = @transform_1, window_bounds = array<i64: 8, 128>}, {transform_indices = @transform_2, window_bounds = array<i64: 8, 128>}, {transform_indices = @transform_3, window_bounds = array<i64: 8, 128>}, {transform_indices = @transform_4, window_bounds = array<i64: 8, 128>}, {transform_indices = @transform_5, window_bounds = array<i64: 8, 128>}, {transform_indices = @transform_6, window_bounds = array<i64: 8, 128>}]} {
    %c0 = arith.constant 0 : index
    %c0_0 = arith.constant 0 : index
    %0 = vector.load %arg2[%c0, %c0_0] : memref<8x128xf32, #tpu.memory_space<vmem>>, vector<8x128xf32>
    %c0_1 = arith.constant 0 : index
    %c0_2 = arith.constant 0 : index
    %1 = vector.load %arg3[%c0_1, %c0_2] : memref<8x128xf32, #tpu.memory_space<vmem>>, vector<8x128xf32>
    %c0_3 = arith.constant 0 : index
    %c0_4 = arith.constant 0 : index
    %2 = vector.load %arg4[%c0_3, %c0_4] : memref<8x128xf32, #tpu.memory_space<vmem>>, vector<8x128xf32>
    %c0_5 = arith.constant 0 : index
    %c0_6 = arith.constant 0 : index
    %3 = vector.load %arg5[%c0_5, %c0_6] : memref<8x128xf32, #tpu.memory_space<vmem>>, vector<8x128xf32>
    %c0_7 = arith.constant 0 : index
    %c0_8 = arith.constant 0 : index
    %4 = vector.load %arg6[%c0_7, %c0_8] : memref<8x128xf32, #tpu.memory_space<vmem>>, vector<8x128xf32>
    %c0_9 = arith.constant 0 : index
    %c0_10 = arith.constant 0 : index
    %5 = vector.load %arg7[%c0_9, %c0_10] : memref<8x128xf32, #tpu.memory_space<vmem>>, vector<8x128xf32>
    %cst = arith.constant 0.000000e+00 : f32
    %6 = vector.broadcast %cst : f32 to vector<8x128xf32>
    %7 = arith.subf %6, %4 : vector<8x128xf32>
    %8 = math.exp %7 : vector<8x128xf32>
    %9 = arith.subf %0, %2 : vector<8x128xf32>
    %10 = arith.mulf %9, %9 : vector<8x128xf32>
    %11 = arith.mulf %8, %10 : vector<8x128xf32>
    %12 = arith.addf %11, %4 : vector<8x128xf32>
    %cst_11 = arith.constant 5.000000e-01 : f32
    %13 = vector.broadcast %cst_11 : f32 to vector<8x128xf32>
    %14 = arith.mulf %13, %12 : vector<8x128xf32>
    %cst_12 = arith.constant 0.000000e+00 : f32
    %15 = vector.broadcast %cst_12 : f32 to vector<8x128xf32>
    %16 = arith.subf %15, %5 : vector<8x128xf32>
    %17 = math.exp %16 : vector<8x128xf32>
    %18 = arith.subf %1, %3 : vector<8x128xf32>
    %19 = arith.mulf %18, %18 : vector<8x128xf32>
    %20 = arith.mulf %17, %19 : vector<8x128xf32>
    %21 = arith.addf %20, %5 : vector<8x128xf32>
    %cst_13 = arith.constant 5.000000e-01 : f32
    %22 = vector.broadcast %cst_13 : f32 to vector<8x128xf32>
    %23 = arith.mulf %22, %21 : vector<8x128xf32>
    %cst_14 = arith.constant -5.000000e-04 : f32
    %24 = vector.broadcast %cst_14 : f32 to vector<8x128xf32>
    %25 = arith.mulf %3, %24 : vector<8x128xf32>
    %26 = math.exp %25 : vector<8x128xf32>
    %27 = arith.mulf %23, %26 : vector<8x128xf32>
    %cst_15 = arith.constant 1.000000e+00 : f32
    %28 = vector.broadcast %cst_15 : f32 to vector<8x128xf32>
    %29 = arith.mulf %27, %28 : vector<8x128xf32>
    %30 = arith.addf %14, %29 : vector<8x128xf32>
    %31 = vector.shape_cast %30 : vector<8x128xf32> to vector<1x8x128xf32>
    %cst_16 = arith.constant dense<0.000000e+00> : vector<8x128xf32>
    %32 = vector.multi_reduction <add>, %31, %cst_16 [0] : vector<1x8x128xf32> to vector<8x128xf32>
    %c0_i32 = arith.constant 0 : i32
    %33 = arith.cmpi eq, %arg1, %c0_i32 : i32
    %34 = arith.extui %33 : i1 to i32
    %c0_i32_17 = arith.constant 0 : i32
    %35 = arith.cmpi ne, %34, %c0_i32_17 : i32
    scf.if %35 {
      %cst_22 = arith.constant 0.000000e+00 : f32
      %39 = vector.broadcast %cst_22 : f32 to vector<8x128xf32>
      %c0_23 = arith.constant 0 : index
      %c0_24 = arith.constant 0 : index
      %40 = vector.load %arg8[%c0_23, %c0_24] : memref<8x128xf32, #tpu.memory_space<vmem>>, vector<8x128xf32>
      tpu.vector_store %arg8[%c0_23, %c0_24], %39 {strides = array<i32>} : memref<8x128xf32, #tpu.memory_space<vmem>>, vector<8x128xf32>,
    } else {
    }
    %c0_18 = arith.constant 0 : index
    %c0_19 = arith.constant 0 : index
    %36 = vector.load %arg8[%c0_18, %c0_19] : memref<8x128xf32, #tpu.memory_space<vmem>>, vector<8x128xf32>
    %37 = arith.addf %36, %32 : vector<8x128xf32>
    %c0_20 = arith.constant 0 : index
    %c0_21 = arith.constant 0 : index
    %38 = vector.load %arg8[%c0_20, %c0_21] : memref<8x128xf32, #tpu.memory_space<vmem>>, vector<8x128xf32>
    tpu.vector_store %arg8[%c0_20, %c0_21], %37 {strides = array<i32>} : memref<8x128xf32, #tpu.memory_space<vmem>>, vector<8x128xf32>,
    return
  }
  func.func @transform_0(%arg0: i32, %arg1: i32) -> (i32, i32) {
    %c1_i32 = arith.constant 1 : i32
    %0 = arith.muli %arg0, %c1_i32 : i32
    %1 = arith.addi %0, %arg1 : i32
    %c0_i32 = arith.constant 0 : i32
    %c0_i32_0 = arith.constant 0 : i32
    return %1, %c0_i32 : i32, i32
  }
  func.func @transform_1(%arg0: i32, %arg1: i32) -> (i32, i32) {
    %c1_i32 = arith.constant 1 : i32
    %0 = arith.muli %arg0, %c1_i32 : i32
    %1 = arith.addi %0, %arg1 : i32
    %c0_i32 = arith.constant 0 : i32
    %c0_i32_0 = arith.constant 0 : i32
    return %1, %c0_i32 : i32, i32
  }
  func.func @transform_2(%arg0: i32, %arg1: i32) -> (i32, i32) {
    %c1_i32 = arith.constant 1 : i32
    %0 = arith.muli %arg0, %c1_i32 : i32
    %1 = arith.addi %0, %arg1 : i32
    %c0_i32 = arith.constant 0 : i32
    %c0_i32_0 = arith.constant 0 : i32
    return %1, %c0_i32 : i32, i32
  }
  func.func @transform_3(%arg0: i32, %arg1: i32) -> (i32, i32) {
    %c1_i32 = arith.constant 1 : i32
    %0 = arith.muli %arg0, %c1_i32 : i32
    %1 = arith.addi %0, %arg1 : i32
    %c0_i32 = arith.constant 0 : i32
    %c0_i32_0 = arith.constant 0 : i32
    return %1, %c0_i32 : i32, i32
  }
  func.func @transform_4(%arg0: i32, %arg1: i32) -> (i32, i32) {
    %c1_i32 = arith.constant 1 : i32
    %0 = arith.muli %arg0, %c1_i32 : i32
    %1 = arith.addi %0, %arg1 : i32
    %c0_i32 = arith.constant 0 : i32
    %c0_i32_0 = arith.constant 0 : i32
    return %1, %c0_i32 : i32, i32
  }
  func.func @transform_5(%arg0: i32, %arg1: i32) -> (i32, i32) {
    %c1_i32 = arith.constant 1 : i32
    %0 = arith.muli %arg0, %c1_i32 : i32
    %1 = arith.addi %0, %arg1 : i32
    %c0_i32 = arith.constant 0 : i32
    %c0_i32_0 = arith.constant 0 : i32
    return %1, %c0_i32 : i32, i32
  }
  func.func @transform_6(%arg0: i32, %arg1: i32) -> (i32, i32) {
    %c0_i32 = arith.constant 0 : i32
    %c0_i32_0 = arith.constant 0 : i32
    return %arg0, %c0_i32 : i32, i32
  }
}

</mosaic_0001>

<bundles_post_ra>
// kernel: tpu_custom_call.1
= control target key start
LH: loop header
LB: loop body
LE: loop exit
PB: predicated region body
PF: predicated region fallthrough
CT: control target
= control target key end

     0   :  { %s1419_s0 = inlined_call_operand.hbm [shape: f32[16,128], index: 0, kind: input, shape index: {}]   ;;  %s1420_s1 = inlined_call_operand.hbm [shape: f32[16,128], index: 1, kind: input, shape index: {}]   ;;  %s1421_s2 = inlined_call_operand.hbm [shape: f32[16,128], index: 2, kind: input, shape index: {}]   ;;  %s1422_s3 = inlined_call_operand.hbm [shape: f32[16,128], index: 3, kind: input, shape index: {}]   ;;  %s1423_s4 = inlined_call_operand.hbm [shape: f32[16,128], index: 4, kind: input, shape index: {}]   ;;  %s1424_s5 = inlined_call_operand.vmem [shape: f32[16,128], index: 5, kind: input, shape index: {}]   ;;  %s1425_s6 = inlined_call_operand.hbm [shape: f32[16,128], index: 6, kind: output, shape index: {}]  }
   0x1   :  { %1437 = sst [smem:[#allocation21_spill]] %s1420_s1 }
   0x2   :  { %1438 = sst [smem:[#allocation22_spill]] %s1422_s3 }
   0x3   :  { %11 = vsyncpa [#allocation3], 0 }
   0x4   :  { %13 = vsyncpa [#allocation3 + $0x1], 0 }
   0x5   :  { %14 = vsyncpa [#allocation6], 0 }
   0x6   :  { %16 = vsyncpa [#allocation6 + $0x1], 0 }
   0x7   :  { %17 = vsyncpa [#allocation9], 0 }
   0x8   :  { %19 = vsyncpa [#allocation9 + $0x1], 0 }
   0x9   :  { %20 = vsyncpa [#allocation4], 0 }
   0xa   :  { %22 = vsyncpa [#allocation4 + $0x1], 0  ;;  %s1094_s21 = smov 0   ;;  %s1096_s22 = smov 0  }
   0xb   :  { %s1098_s23 = smov 0   ;;  %s1100_s24 = smov 0  }
   0xc   :  { %s1102_s25 = smov 0   ;;  %s1104_s26 = smov 0  }
   0xd LB: > { %1439 = sst [smem:[#allocation16_spill]] %s1047_s25  ;;  %s1125_s27 = sadd.s32 4294967295, %s1051_s26   ;;  %s1051_s26 = sphi %s1104_s26, %s28_s26   ;;  %s1047_s25 = sphi %s1102_s25, %s1470_s25   ;;  %s1043_s24 = sphi %s1100_s24, %s1469_s24   ;;  %s1039_s23 = sphi %s1098_s23, %s1473_s23   ;;  %s1035_s22 = sphi %s1096_s22, %s1472_s22   ;;  %s1031_s21 = sphi %s1094_s21, %s1471_s21  }
   0xe   : > { %1440 = sst [smem:[#allocation17_spill]] %s1051_s26  ;;  %s697_s28 = sadd.s32 4294967294, %s1051_s26  }
   0xf   : > { %s40_s29 = sadd.s32 1, %s1047_s25  ;;  %s49_s30 = sadd.s32 1, %s1039_s23 }
  0x10   : > { %p42_p0 = scmp.ge.s32.totalorder %s40_s29, 2  ;;  %p56_p1 = scmp.ne.s32.totalorder %s1039_s23, %s1035_s22 }
  0x11   : > { %p57_p2 = scmp.eq.s32.totalorder %s1051_s26, 0  ;;  %p62_p3 = scmp.ne.s32.totalorder %s1035_s22, %s1031_s21 }
  0x12   : > { %s1475_s29 = smov (%p42_p0, %s40_s29), 0  ;;  %p63_p5 = scmp.eq.s32.totalorder %s1125_s27, 0 }
  0x13   : > { %1441 = sst [smem:[#allocation18_spill]] %s1475_s29  ;;  %p1137_p4 = por %p57_p2, %p56_p1 }
  0x14   : > { %s46_s8 = ssub.s32 %s1047_s25, %s1475_s29  ;;  %p226_p6 = scmp.eq.s32.totalorder %s1125_s27, 1 }
  0x15   : > { %p47_p7 = scmp.eq.s32.totalorder %s46_s8, 0  ;;  %p1145_p8 = por %p63_p5, %p62_p3 }
  0x16   : > { %p1149_p9 = por %p226_p6, %p56_p1  ;;  %p232_p10 = scmp.eq.s32.totalorder %s697_s28, 1 }
  0x17   : > { %s1443_s9 = scalar_select %p1145_p8, 1, 0 }
  0x18   : > { %s1444_s10 = scalar_select %p1149_p9, 1, 0 }
  0x19   : > { %s1154_s11 = scalar_select %p47_p7, %s1039_s23, %s49_s30  }
  0x1a   : > { %p1156_p11 = por %p232_p10, %p62_p3  ;;  %p754_p13 = scmp.lt.s32.totalorder %s1051_s26, 2 }
  0x1b   : > { %1445 = sst [smem:[#allocation19_spill]] %s1154_s11  ;;  %s1426_s13 = sand.u32 1, %s1039_s23  }
  0x1c   : > { %s1446_s12 = scalar_select %p1156_p11, 1, 0 }
  0x1d   : > { %s1165_s14 = sshll.u32 %s1426_s13, 3  ;;  %s1168_s15 = sshll.u32 %s1047_s25, 7 }
  0x1e   : > { %1447 = sst [smem:[#allocation20_spill]] %s1446_s12  ;;  %p1172_p0 = pnand %p754_p13, %p1137_p4 }
  0x1f   : > { %s1429_s17 = sand.u32 1, %s1051_s26   ;;  %s1449_s1 = sld [smem:[#allocation21_spill]] }
  0x20   : > { %s1448_s16 = scalar_select %p1172_p0, 1, 0 }
  0x21   : > { %s275_s28 = scalar_lea.vmem [#allocation5], %s1165_s14  ;;  %s1190_s7 = scalar_lea.sflag [#allocation6], %s1429_s17 }
  0x22   : > { %s283_s30 = sshll.u32 %s275_s28, 4  ;;  %p1196_p4 = pneg %p1172_p0  ;;  %s1185_s30 = int_to_ptr.vmem [resolvable:$true] %s283_s30 }
  0x25   : > { %s1181_s20 = scalar_lea.hbm %s1449_s1, %s1168_s15  ;;  %s816_s13 = scalar_lea.hbm %s1449_s1, 256 }
  0x26   : > { %s811_s8 = scalar_lea.hbm %s1181_s20, 128  ;;  %p817_p7 = scmp.lt.u32.totalorder %s1181_s20, %s1449_s1 }
  0x27   : > { %p812_p3 = scmp.ne.s32.totalorder %s1181_s20, %s811_s8  ;;  %p818_p10 = scmp.lt.u32.totalorder %s816_s13, %s811_s8 }
  0x28   : > { %p820_p12 = scmp.lt.u32.totalorder %s811_s8, %s1181_s20 }
  0x29   : > { %p814_p5 = pnand %p1196_p4, %p812_p3  ;;  %p819_p13 = por %p818_p10, %p817_p7 }
  0x2b   : > { %p815_p6 = pneg %p814_p5  ;;  %p821_p1 = por %p820_p12, %p819_p13 }
  0x2d   : > { %p822_p2 = pnand %p821_p1, %p815_p6 }
  0x2f   : > { %825 = shalt.err (!%p822_p2)
}
  0x30   : > { %s826_s17 = scalar_lea.vmem %s1185_s30, 128  ;;  %s1053_s19 = smov [#allocation5]  }
  0x31   : > { %p827_p3 = scmp.ne.s32.totalorder %s1185_s30, %s826_s17  ;;  %s831_s28 = sshll.u32 %s1053_s19, 4  ;;  %s832_s28 = int_to_ptr.vmem [resolvable:$false] %s831_s28 }
  0x32   : > { %s833_s25 = scalar_lea.vmem %s832_s28, 256  ;;  %p834_p9 = scmp.lt.s32.totalorder %s1185_s30, %s832_s28 }
  0x33   : > { %p829_p5 = pnand %p827_p3, %p1196_p4  ;;  %p835_p8 = scmp.lt.s32.totalorder %s833_s25, %s826_s17 }
  0x35   : > { %p830_p11 = pneg %p829_p5  ;;  %p836_p7 = por %p835_p8, %p834_p9 }
  0x37   : > { %p837_p10 = pnand %p836_p7, %p830_p11 }
  0x39   : > { %840 = shalt.err (!%p837_p10)
}
  0x3a   : > { %740 = dma.hbm_to_vmem [thread:$0]  (!%p1172_p0), %s1181_s20, 128, %s1185_s30, %s1190_s7  }
  0x3b   : > { %p1451_p12 = scmp.lt.s32.totalorder %s1051_s26, 3  ;;  %p1452_p1 = scmp.ge.s32.totalorder %s1051_s26, 1 }
  0x3c   : > { %s1454_s3 = sld [smem:[#allocation22_spill]]  ;;  %s313_s19 = scalar_lea.vmem [#allocation8], %s1165_s14 }
  0x3d   : > { %p1224_p2 = pnand %p1452_p1, %p1451_p12  ;;  %s321_s28 = sshll.u32 %s313_s19, 4  ;;  %s322_s28 = int_to_ptr.vmem [resolvable:$true] %s321_s28 }
  0x3e   : > { %s1455_s25 = sand.u32 1, %s1051_s26  }
  0x3f   : > { %s1453_s29 = scalar_select %p1224_p2, 1, 0 }
  0x40   : > { %s1237_s20 = scalar_lea.sflag [#allocation9], %s1455_s25 }
  0x42   : > { %s1232_s8 = scalar_lea.hbm %s1454_s3, %s1168_s15  ;;  %s846_s13 = scalar_lea.hbm %s1454_s3, 256 }
  0x43   : > { %s841_s30 = scalar_lea.hbm %s1232_s8, 128  ;;  %p847_p6 = scmp.lt.u32.totalorder %s1232_s8, %s1454_s3 }
  0x44   : > { %p842_p8 = scmp.ne.s32.totalorder %s1232_s8, %s841_s30  ;;  %p848_p13 = scmp.lt.u32.totalorder %s846_s13, %s841_s30 }
  0x45   : > { %p850_p5 = scmp.lt.u32.totalorder %s841_s30, %s1232_s8 }
  0x46   : > { %p844_p9 = pnand %p842_p8, %p1196_p4  ;;  %p849_p3 = por %p848_p13, %p847_p6 }
  0x48   : > { %p845_p11 = pneg %p844_p9  ;;  %p851_p7 = por %p850_p5, %p849_p3 }
  0x4a   : > { %p852_p10 = pnand %p851_p7, %p845_p11 }
  0x4c   : > { %855 = shalt.err (!%p852_p10)
}
  0x4d   : > { %s856_s19 = scalar_lea.vmem %s322_s28, 128  ;;  %s1054_s25 = smov [#allocation8]  }
  0x4e   : > { %p857_p12 = scmp.ne.s32.totalorder %s322_s28, %s856_s19  ;;  %s861_s26 = sshll.u32 %s1054_s25, 4  ;;  %s862_s26 = int_to_ptr.vmem [resolvable:$false] %s861_s26 }
  0x4f   : > { %s863_s1 = scalar_lea.vmem %s862_s26, 256  ;;  %p864_p9 = scmp.lt.s32.totalorder %s322_s28, %s862_s26 }
  0x50   : > { %p859_p1 = pnand %p857_p12, %p1196_p4  ;;  %p865_p2 = scmp.lt.s32.totalorder %s863_s1, %s856_s19 }
  0x52   : > { %p860_p8 = pneg %p859_p1  ;;  %p866_p0 = por %p865_p2, %p864_p9 }
  0x54   : > { %p867_p6 = pnand %p866_p0, %p860_p8 }
  0x56   : > { %870 = shalt.err (!%p867_p6)
}
  0x57   : > { %p1456_p13 = scmp.ne.s32.totalorder %s1448_s16, 0  ;;  %s1261_s30 = scalar_lea.hbm %s1419_s0, %s1168_s15 }
  0x58   : > { %s256_s26 = scalar_lea.vmem [#allocation2], %s1165_s14  ;;  %s1457_s17 = sand.u32 1, %s1039_s23  }
  0x59   : > { %746 = dma.hbm_to_vmem [thread:$0]  (!%p1456_p13), %s1232_s8, 128, %s322_s28, %s1237_s20  }
  0x5a   : > { %s264_s13 = sshll.u32 %s256_s26, 4  ;;  %s253_s19 = scalar_lea.sflag [#allocation3], %s1457_s17  ;;  %s265_s13 = int_to_ptr.vmem [resolvable:$true] %s264_s13 }
  0x5b   : > { %s871_s25 = scalar_lea.hbm %s1261_s30, 128  ;;  %s876_s1 = scalar_lea.hbm %s1419_s0, 256 }
  0x5c   : > { %p872_p0 = scmp.ne.s32.totalorder %s1261_s30, %s871_s25  ;;  %p877_p3 = scmp.lt.u32.totalorder %s1261_s30, %s1419_s0 }
  0x5d   : > { %p878_p5 = scmp.lt.u32.totalorder %s876_s1, %s871_s25  ;;  %p880_p10 = scmp.lt.u32.totalorder %s871_s25, %s1261_s30 }
  0x5e   : > { %p874_p2 = pnand %p872_p0, %p1196_p4 }
  0x5f   : > { %p879_p7 = por %p878_p5, %p877_p3 }
  0x60   : > { %p875_p11 = pneg %p874_p2 }
  0x61   : > { %p881_p12 = por %p880_p10, %p879_p7 }
  0x63   : > { %p882_p1 = pnand %p881_p12, %p875_p11 }
  0x65   : > { %885 = shalt.err (!%p882_p1)
}
  0x66   : > { %s886_s26 = scalar_lea.vmem %s265_s13, 128  ;;  %s1055_s17 = smov [#allocation2]  }
  0x67   : > { %p887_p8 = scmp.ne.s32.totalorder %s265_s13, %s886_s26  ;;  %s891_s3 = sshll.u32 %s1055_s17, 4  ;;  %s892_s3 = int_to_ptr.vmem [resolvable:$false] %s891_s3 }
  0x68   : > { %s893_s8 = scalar_lea.vmem %s892_s3, 256  ;;  %p894_p0 = scmp.lt.s32.totalorder %s265_s13, %s892_s3 }
  0x69   : > { %p889_p9 = pnand %p887_p8, %p1196_p4  ;;  %p895_p2 = scmp.lt.s32.totalorder %s893_s8, %s886_s26 }
  0x6b   : > { %p890_p6 = pneg %p889_p9  ;;  %p896_p13 = por %p895_p2, %p894_p0 }
  0x6d   : > { %p897_p3 = pnand %p896_p13, %p890_p6 }
  0x6f   : > { %900 = shalt.err (!%p897_p3)
}
  0x70   : > { %p1458_p5 = scmp.ne.s32.totalorder %s1448_s16, 0  ;;  %s1287_s1 = scalar_lea.hbm %s1421_s2, %s1168_s15 }
  0x71   : > { %s294_s3 = scalar_lea.vmem [#allocation7], %s1165_s14  ;;  %s901_s12 = scalar_lea.hbm %s1287_s1, 128 }
  0x72   : > { %737 = dma.hbm_to_vmem [thread:$0]  (!%p1458_p5), %s1261_s30, 128, %s265_s13, %s253_s19  }
  0x73   : > { %s302_s11 = sshll.u32 %s294_s3, 4  ;;  %p902_p13 = scmp.ne.s32.totalorder %s1287_s1, %s901_s12  ;;  %s303_s11 = int_to_ptr.vmem [resolvable:$true] %s302_s11 }
  0x74   : > { %s906_s30 = scalar_lea.hbm %s1421_s2, 256  ;;  %p907_p10 = scmp.lt.u32.totalorder %s1287_s1, %s1421_s2 }
  0x75   : > { %p904_p11 = pnand %p902_p13, %p1196_p4  ;;  %p908_p12 = scmp.lt.u32.totalorder %s906_s30, %s901_s12 }
  0x76   : > { %p910_p8 = scmp.lt.u32.totalorder %s901_s12, %s1287_s1 }
  0x77   : > { %p905_p7 = pneg %p904_p11  ;;  %p909_p1 = por %p908_p12, %p907_p10 }
  0x79   : > { %p911_p9 = por %p910_p8, %p909_p1 }
  0x7b   : > { %p912_p6 = pnand %p911_p9, %p905_p7 }
  0x7d   : > { %915 = shalt.err (!%p912_p6)
}
  0x7e   : > { %s916_s8 = scalar_lea.vmem %s303_s11, 128  ;;  %s1056_s25 = smov [#allocation7]  }
  0x7f   : > { %p917_p0 = scmp.ne.s32.totalorder %s303_s11, %s916_s8  ;;  %s921_s28 = sshll.u32 %s1056_s25, 4  ;;  %s922_s28 = int_to_ptr.vmem [resolvable:$false] %s921_s28 }
  0x80   : > { %s923_s3 = scalar_lea.vmem %s922_s28, 256  ;;  %p924_p13 = scmp.lt.s32.totalorder %s303_s11, %s922_s28 }
  0x81   : > { %p919_p2 = pnand %p917_p0, %p1196_p4  ;;  %p925_p11 = scmp.lt.s32.totalorder %s923_s3, %s916_s8 }
  0x83   : > { %p920_p3 = pneg %p919_p2  ;;  %p926_p5 = por %p925_p11, %p924_p13 }
  0x85   : > { %p927_p10 = pnand %p926_p5, %p920_p3 }
  0x87   : > { %930 = shalt.err (!%p927_p10)
}
  0x88   : > { %p1459_p12 = scmp.ne.s32.totalorder %s1448_s16, 0  ;;  %s1312_s17 = scalar_lea.hbm %s1423_s4, %s1168_s15 }
  0x89   : > { %s332_s30 = scalar_lea.vmem [#allocation10], %s1165_s14  ;;  %s931_s19 = scalar_lea.hbm %s1312_s17, 128 }
  0x8a   : > { %743 = dma.hbm_to_vmem [thread:$0]  (!%p1459_p12), %s1287_s1, 128, %s303_s11, %s1190_s7  }
  0x8b   : > { %s340_s13 = sshll.u32 %s332_s30, 4  ;;  %p932_p5 = scmp.ne.s32.totalorder %s1312_s17, %s931_s19  ;;  %s341_s13 = int_to_ptr.vmem [resolvable:$true] %s340_s13 }
  0x8c   : > { %s936_s7 = scalar_lea.hbm %s1423_s4, 256  ;;  %p937_p8 = scmp.lt.u32.totalorder %s1312_s17, %s1423_s4 }
  0x8d   : > { %p934_p7 = pnand %p932_p5, %p1196_p4  ;;  %p938_p9 = scmp.lt.u32.totalorder %s936_s7, %s931_s19 }
  0x8e   : > { %p940_p0 = scmp.lt.u32.totalorder %s931_s19, %s1312_s17 }
  0x8f   : > { %p935_p1 = pneg %p934_p7  ;;  %p939_p6 = por %p938_p9, %p937_p8 }
  0x91   : > { %p941_p2 = por %p940_p0, %p939_p6 }
  0x93   : > { %p942_p3 = pnand %p941_p2, %p935_p1 }
  0x95   : > { %945 = shalt.err (!%p942_p3)
}
  0x96   : > { %s946_s14 = scalar_lea.vmem %s341_s13, 128  ;;  %s1057_s15 = smov [#allocation10]  }
  0x97   : > { %p947_p13 = scmp.ne.s32.totalorder %s341_s13, %s946_s14  ;;  %s951_s28 = sshll.u32 %s1057_s15, 4  ;;  %s952_s28 = int_to_ptr.vmem [resolvable:$false] %s951_s28 }
  0x98   : > { %s953_s3 = scalar_lea.vmem %s952_s28, 256  ;;  %p954_p5 = scmp.lt.s32.totalorder %s341_s13, %s952_s28 }
  0x99   : > { %p949_p11 = pnand %p947_p13, %p1196_p4  ;;  %p955_p7 = scmp.lt.s32.totalorder %s953_s3, %s946_s14 }
  0x9b   : > { %p950_p10 = pneg %p949_p11  ;;  %p956_p12 = por %p955_p7, %p954_p5 }
  0x9d   : > { %p957_p8 = pnand %p956_p12, %p950_p10 }
  0x9f   : > { %960 = shalt.err (!%p957_p8)
}
  0xa0   : > { %p1460_p9 = scmp.ne.s32.totalorder %s1448_s16, 0  ;;  %p1461_p1 = scmp.ne.s32.totalorder %s1453_s29, 0 }
  0xa1   : > { %s1336_s18 = sand.u32 (!%p1461_p1), 1, %s1035_s22   ;;  %p1462_p4 = scmp.ne.s32.totalorder (!%p1461_p1), %s1443_s9, 0 }
  0xa2   : > { %749 = dma.hbm_to_vmem [thread:$0]  (!%p1460_p9), %s1312_s17, 128, %s341_s13, %s1237_s20  }
  0xa3   : > { %358 = sbr.rel (%p1461_p1) target bundleno = 223 (0xdf), region = 44  ;;  %s1339_s12 = sshll.u32 (!%p1461_p1), %s1336_s18, 3 }
  0xa4   : > { %s361_s26 = scalar_lea.sflag (!%p1461_p1), [#allocation3], %s1336_s18  ;;  %s364_s30 = scalar_lea.vmem (!%p1461_p1), [#allocation2], %s1339_s12 }
  0xaa   : > { %1014 = dma.done.wait (%p1462_p4), %s361_s26, 128  }
  0xab   : > { %1016 = vsyncadd (%p1462_p4), %s361_s26, 4294967168  ;;  %s369_s16 = sand.u32 1, %s1125_s27   ;;  %s373_s20 = scalar_lea.vmem [#allocation5], %s1339_s12 }
  0xac   : > { %s370_s29 = scalar_lea.sflag [#allocation6], %s369_s16 }
  0xad   : > { %1018 = dma.done.wait (%p1462_p4), %s370_s29, 256  }
  0xae   : > { %1020 = vsyncadd (%p1462_p4), %s370_s29, 4294967040  ;;  %s382_s17 = scalar_lea.vmem [#allocation7], %s1339_s12  ;;  %s388_s13 = scalar_lea.sflag [#allocation9], %s369_s16 }
  0xaf   : > { %s391_s19 = scalar_lea.vmem [#allocation8], %s1339_s12 }
  0xb0   : > { %1022 = dma.done.wait (%p1462_p4), %s388_s13, 256  }
  0xb1   : > { %1024 = vsyncadd (%p1462_p4), %s388_s13, 4294967040  ;;  %p460_p12 = scmp.lt.s32.totalorder %s1043_s24, 1  ;;  %v468_v0 = vld [vmem:[%s391_s19] sm:$0xff]  ;;  %s400_s11 = scalar_lea.vmem [#allocation10], %s1339_s12  ;;  %v465_v8 = vld [vmem:[%s364_s30] sm:$0xff] }
  0xb2   : > { %v469_v1 = vld [vmem:[%s400_s11] sm:$0xff]  ;;  %v487_v5 = vmul.f32 -0.0005, %v468_v0  ;;  %v466_v10 = vld [vmem:[%s373_s20] sm:$0xff]  ;;  %s719_s9 = sshll.u32 %s1043_s24, 7  ;;  %s453_s14 = scalar_lea.vmem [#allocation11], %s1339_s12 }
  0xb3   : > { %s461_s27 = scalar_select %p460_p12, %s1043_s24, 1  ;;  %v471_v3 = vsub.f32 0.0, %v469_v1  ;;  %v467_v9 = vld [vmem:[%s382_s17] sm:$0xff]  ;;  %v482_v13 = vsub.f32 %v466_v10, %v468_v0 }
  0xb4   : > { %v488_v11 = vmul.f32 1.442695, %v487_v5  ;;  %v474_v12 = vsub.f32 %v465_v8, %v467_v9  ;;  %s515_s15 = sshll.u32 %s453_s14, 4  ;;  %s1370_s26 = scalar_lea.hbm %s1425_s6, %s719_s9  ;;  %s1372_s15 = int_to_ptr.vmem [resolvable:$true] %s515_s15 }
  0xb5   : > { %s717_s8 = sshll.u32 %s461_s27, 3  ;;  %v472_v6 = vmul.f32 1.442695, %v471_v3  ;;  %v483_v15 = vmul.f32 %v482_v13, %v482_v13  ;;  %s502_s30 = scalar_lea.sflag [#allocation4], %s1336_s18 }
  0xb6   : > { %s463_s1 = scalar_lea.vmem %s1424_s5, %s717_s8  ;;  %v475_v14 = vmul.f32 %v474_v12, %v474_v12  ;;  %s961_s16 = scalar_lea.vmem %s1372_s15, 128 }
  0xb7   : > { %v470_v2 = vld [vmem:[%s463_s1] sm:$0xff]  ;;  %805 = vpow2.f32 %v472_v6  ;;  %p962_p6 = scmp.ne.s32.totalorder %s1372_s15, %s961_s16  ;;  %p1463_p0 = scmp.ne.s32.totalorder %s1444_s10, 0 }
  0xb8   : > { %v479_v4 = vsub.f32 0.0, %v470_v2  ;;  %s1058_s24 = smov [#allocation11]  }
  0xb9   : > { %p963_p2 = pnand %p962_p6, %p1463_p0  ;;  %s965_s12 = sshll.u32 %s1058_s24, 4  ;;  %s966_s12 = int_to_ptr.vmem [resolvable:$false] %s965_s12 }
  0xba   : > { %v480_v7 = vmul.f32 1.442695, %v479_v4  ;;  %s967_s29 = scalar_lea.vmem %s966_s12, 256  ;;  %p968_p13 = scmp.lt.s32.totalorder %s1372_s15, %s966_s12 }
  0xbb   : > { %p964_p3 = pneg %p963_p2  ;;  %p969_p11 = scmp.lt.s32.totalorder %s967_s29, %s961_s16 }
  0xbc   : > { %807 = vpow2.f32 %v480_v7 }
  0xbd   : > { %809 = vpow2.f32 %v488_v11  ;;  %p970_p10 = por %p969_p11, %p968_p13 }
  0xbf   : > { %p971_p5 = pnand %p970_p10, %p964_p3 }
  0xc1   : > { %v806_v16 = vpop.eup %805 }
  0xc2   : > { %v476_v18 = vmul.f32 %v806_v16, %v475_v14 }
  0xc4   : > { %v477_v20 = vadd.f32 %v476_v18, %v469_v1 }
  0xc6   : > { %v808_v17 = vpop.eup %807  ;;  %v478_v23 = vmul.f32 0.5, %v477_v20 }
  0xc7   : > { %v484_v19 = vmul.f32 %v808_v17, %v483_v15  ;;  %v810_v22 = vpop.eup %809 }
  0xc9   : > { %v485_v21 = vadd.f32 %v484_v19, %v470_v2 }
  0xcb   : > { %v486_v24 = vmul.f32 0.5, %v485_v21 }
  0xcd   : > { %v490_v25 = vmul.f32 %v810_v22, %v486_v24 }
  0xcf   : > { %v491_v26 = vadd.f32 %v490_v25, %v478_v23 }
  0xd1   : > { %500 = vst [vmem:[%s453_s14] sm:$0xff] %v491_v26 }
  0xd2   : > { %974 = shalt.err (!%p971_p5)
}
  0xd3   : > { %s975_s18 = scalar_lea.hbm %s1370_s26, 128  ;;  %s979_s13 = scalar_lea.hbm %s1425_s6, 256 }
  0xd4   : > { %p976_p7 = scmp.ne.s32.totalorder %s1370_s26, %s975_s18  ;;  %p980_p1 = scmp.lt.u32.totalorder %s1370_s26, %s1425_s6 }
  0xd5   : > { %p981_p4 = scmp.lt.u32.totalorder %s979_s13, %s975_s18  ;;  %p983_p6 = scmp.lt.u32.totalorder %s975_s18, %s1370_s26 }
  0xd6   : > { %p977_p8 = pnand %p976_p7, %p1463_p0 }
  0xd7   : > { %p982_p12 = por %p981_p4, %p980_p1 }
  0xd8   : > { %p978_p9 = pneg %p977_p8 }
  0xd9   : > { %p984_p2 = por %p983_p6, %p982_p12 }
  0xdb   : > { %p985_p3 = pnand %p984_p2, %p978_p9 }
  0xdd   : > { %988 = shalt.err (!%p985_p3)
}
  0xde   : > { %732 = dma.vmem_to_hbm [thread:$0]  (%p1463_p0), %s1372_s15, 128, %s1370_s26, %s502_s30  }
  0xdf PF: > { %s1464_s8 = sld [smem:[#allocation20_spill]]  ;;  %s1465_s25 = sld [smem:[#allocation17_spill]] }
  0xe0   : > { %s527_s7 = sand.u32 1, %s1031_s21  }
  0xe1   : > { %s528_s1 = scalar_lea.sflag [#allocation4], %s527_s7 }
  0xe5   : > { %p1466_p13 = scmp.ne.s32.totalorder %s1464_s8, 0  ;;  %p1467_p11 = scmp.ge.s32.totalorder %s1465_s25, 2 }
  0xe7   : > { %p751_p10 = pnand %p1467_p11, %p1466_p13 }
  0xe9   : > { %1026 = dma.done.wait (!%p751_p10), %s528_s1, 128  }
  0xea   : > { %1028 = vsyncadd (!%p751_p10), %s528_s1, 4294967168  ;;  %s28_s26 = sadd.s32 1, %s1465_s25   ;;  %s1468_s10 = sld [smem:[#allocation19_spill]] }
  0xeb   : > { %p25_p5 = scmp.ge.s32.totalorder %s28_s26, 4   ;;  %s1469_s24 = sld [smem:[#allocation16_spill]] }
  0xec   : > { %s1470_s25 = sld [smem:[#allocation18_spill]]  ;;  %s1471_s21 = smov %s1035_s22 }
  0xed   : > { %s1472_s22 = smov %s1039_s23  ;;  %27 = sbr.rel (!%p25_p5) target bundleno = 13 (0xd), region = 144 }
  0xf0   : > { %s1473_s23 = smov %s1468_s10 }
  0xf4   :  { %533 = vsyncpa [#allocation3], 1 }
  0xf5   :  { %535 = vsyncpa [#allocation3 + $0x1], 1 }
  0xf6   :  { %536 = vsyncpa [#allocation6], 1 }
  0xf7   :  { %538 = vsyncpa [#allocation6 + $0x1], 1 }
  0xf8   :  { %539 = vsyncpa [#allocation9], 1 }
  0xf9   :  { %541 = vsyncpa [#allocation9 + $0x1], 1 }
  0xfa   :  { %542 = vsyncpa [#allocation4], 1 }
  0xfb   :  { %544 = vsyncpa [#allocation4 + $0x1], 1 }

</bundles_post_ra>
